<compile_context>
chip_gen: v6e
topology: v6e:2x2x1
jax: 0.10.0
libtpu: 0.0.40
codegen_flags: <defaults>
</compile_context>

<pallas_src>
import functools

import jax
import jax.numpy as jnp
from jax.experimental import pallas as pl
from jax.experimental.pallas import tpu as pltpu


def _qnet_kernel(x_ref, w1_ref, b1_ref, w2_ref, b2_ref, w3_ref, b3_ref, out_ref):
    # Fused forward: fc1 -> relu -> fc2 -> relu -> fc3, all in VMEM, f32 accum.
    wt = w1_ref.dtype  # compute dtype at the MXU boundary (f32 or bf16)
    x = x_ref[...].astype(wt)
    h1 = jnp.dot(x, w1_ref[...], preferred_element_type=jnp.float32) + b1_ref[...]
    h1 = jnp.maximum(h1, 0.0)
    h2 = jnp.dot(h1.astype(wt), w2_ref[...], preferred_element_type=jnp.float32) + b2_ref[...]
    h2 = jnp.maximum(h2, 0.0)
    q = jnp.dot(h2.astype(wt), w3_ref[...], preferred_element_type=jnp.float32) + b3_ref[...]
    out_ref[...] = q.astype(out_ref.dtype)


def _cdiv(a, b):
    return (a + b - 1) // b


def _round_up(n, m):
    return _cdiv(n, m) * m


def _pad2(a, rows, cols):
    r, c = a.shape
    return jnp.pad(a, ((0, rows - r), (0, cols - c)))


def prepare_params(w1, b1, w2, b2, w3, b3, param_dtype=jnp.float32):
    """One-time padding (and optional bf16 cast) of the QNet parameters.

    Hidden/output feature dims are zero-padded to multiples of 128 so every
    matmul and the output store are lane-dense. Zero K/N columns plus zero
    bias keep the padded units inert (relu(0)=0), so results are unchanged.
    Called once outside the hot path; the jitted forward takes the result.
    """
    state_dim, hidden_dim = w1.shape
    action_dim = w3.shape[1]
    d_h = _round_up(hidden_dim, 128)
    d_out = _round_up(action_dim, 128)

    w1p = _pad2(w1, state_dim, d_h).astype(param_dtype)   # K stays = state_dim
    w2p = _pad2(w2, d_h, d_h).astype(param_dtype)
    w3p = _pad2(w3, d_h, d_out).astype(param_dtype)
    # Biases stay f32: they are added to the f32 MXU accumulator.
    b1p = _pad2(b1, 1, d_h).astype(jnp.float32)
    b2p = _pad2(b2, 1, d_h).astype(jnp.float32)
    b3p = _pad2(b3, 1, d_out).astype(jnp.float32)
    return (w1p, b1p, w2p, b2p, w3p, b3p), action_dim


@functools.partial(jax.jit, static_argnames=("action_dim", "block_batch"))
def qnet_forward(x, params, action_dim, block_batch=512):
    """x: (B, state_dim) f32, params from prepare_params -> (B, action_dim) f32."""
    w1p, b1p, w2p, b2p, w3p, b3p = params
    batch, state_dim = x.shape
    assert w1p.shape[0] == state_dim, "x feature dim must match fc1 in_features"
    d_h = w1p.shape[1]
    d_out = w3p.shape[1]

    # 8-aligned batch tile chosen to minimise padding waste: split the batch
    # evenly across cdiv(batch, block_batch) tiles (>=2 tiles for big batches
    # so the "parallel" grid actually engages both v7x TensorCores).
    n_tiles = max(1, _cdiv(batch, block_batch))
    tb = _round_up(_cdiv(batch, n_tiles), 8)
    padded_b = _round_up(batch, tb)
    grid = (padded_b // tb,)

    # Pad only the batch axis of x (zero rows, sliced off at the end).
    xp = _pad2(x, padded_b, state_dim)

    # Weights/biases: constant block index -> resident in VMEM across steps.
    resident = lambda a: pl.BlockSpec(a.shape, lambda i: (0, 0))

    # VMEM budget: double-buffered x/out tiles + resident params + f32
    # h1/h2 intermediates + scratch headroom.
    x_bytes = jnp.dtype(x.dtype).itemsize
    w_bytes = jnp.dtype(w1p.dtype).itemsize
    io_bytes = 2 * tb * (state_dim * x_bytes + d_out * 4)
    param_bytes = (state_dim * d_h + d_h * d_h + d_h * d_out) * w_bytes \
        + (2 * d_h + d_out) * 4
    interm_bytes = 2 * tb * d_h * 4
    vmem_limit = int(min(max(io_bytes + param_bytes + interm_bytes + (2 << 20),
                             4 << 20), 48 << 20))

    out = pl.pallas_call(
        _qnet_kernel,
        out_shape=jax.ShapeDtypeStruct((padded_b, d_out), jnp.float32),
        grid=grid,
        in_specs=[
            # x: tiled over batch; last dim = full array dim (no 128 pad).
            pl.BlockSpec((tb, state_dim), lambda i: (i, 0)),
            resident(w1p), resident(b1p),
            resident(w2p), resident(b2p),
            resident(w3p), resident(b3p),
        ],
        out_specs=pl.BlockSpec((tb, d_out), lambda i: (i, 0)),  # lane-dense out
        compiler_params=pltpu.CompilerParams(
            dimension_semantics=("parallel",),
            vmem_limit_bytes=vmem_limit,
        ),
    )(xp, w1p, b1p, w2p, b2p, w3p, b3p)

    return out[:batch, :action_dim]


def init_qnet_params(key, state_dim, action_dim, hidden_dim=128):
    """Deterministic init mimicking PyTorch nn.Linear default U(-1/sqrt(fan_in), +)."""

    def linear(key, fan_in, fan_out):
        kw, kb = jax.random.split(key)
        bound = 1.0 / jnp.sqrt(jnp.float32(fan_in))
        w = jax.random.uniform(kw, (fan_in, fan_out), jnp.float32, -bound, bound)
        b = jax.random.uniform(kb, (1, fan_out), jnp.float32, -bound, bound)
        return w, b

    k1, k2, k3 = jax.random.split(key, 3)
    w1, b1 = linear(k1, state_dim, hidden_dim)
    w2, b2 = linear(k2, hidden_dim, hidden_dim)
    w3, b3 = linear(k3, hidden_dim, action_dim)
    return w1, b1, w2, b2, w3, b3


def qnet_reference(x, w1, b1, w2, b2, w3, b3):
    h = jnp.maximum(x @ w1 + b1, 0.0)
    h = jnp.maximum(h @ w2 + b2, 0.0)
    return h @ w3 + b3


if __name__ == "__main__":
    key = jax.random.PRNGKey(0)
    k_params, k_x = jax.random.split(key)

    batch = 8
    state_dim = 16
    hidden_dim = 128   # QNet default
    action_dim = 4

    raw = init_qnet_params(k_params, state_dim, action_dim, hidden_dim)
    x = jax.random.normal(k_x, (batch, state_dim), jnp.float32)
    q_ref = qnet_reference(x, *raw)

    # f32 path: exact parity with the reference.
    params_f32, adim = prepare_params(*raw, param_dtype=jnp.float32)
    q = qnet_forward(x, params_f32, action_dim=adim)
    jax.block_until_ready(q)
    assert q.shape == (batch, action_dim)
    assert jnp.allclose(q, q_ref, atol=1e-5, rtol=1e-5), "f32 mismatch vs reference"

    # bf16-at-the-MXU path (recommended on v5e/v6e/v7x): relaxed tolerance.
    params_bf16, _ = prepare_params(*raw, param_dtype=jnp.bfloat16)
    q_bf16 = qnet_forward(x, params_bf16, action_dim=adim)
    jax.block_until_ready(q_bf16)
    assert jnp.allclose(q_bf16, q_ref, atol=5e-2, rtol=5e-2), "bf16 mismatch vs reference"

    # Multi-tile / parallel-grid path: non-multiple batch exercises balanced
    # 8-aligned tiles (1048 -> 3 tiles of 352, padded_b=1056, <1% waste).
    big_b = 1024 + 24
    xb = jax.random.normal(jax.random.PRNGKey(1), (big_b, state_dim), jnp.float32)
    qb = qnet_forward(xb, params_f32, action_dim=adim)
    jax.block_until_ready(qb)
    assert qb.shape == (big_b, action_dim)
    assert jnp.allclose(qb, qnet_reference(xb, *raw), atol=1e-4, rtol=1e-4)

    print("KERNEL_OK")
</pallas_src>

<mosaic_0001>
module attributes {stable_mosaic.version = 11 : i64} {
  func.func @_qnet_kernel(%arg0: i32, %arg1: memref<8x16xf32, #tpu.memory_space<vmem>>, %arg2: memref<16x128xf32, #tpu.memory_space<vmem>>, %arg3: memref<1x128xf32, #tpu.memory_space<vmem>>, %arg4: memref<128x128xf32, #tpu.memory_space<vmem>>, %arg5: memref<1x128xf32, #tpu.memory_space<vmem>>, %arg6: memref<128x128xf32, #tpu.memory_space<vmem>>, %arg7: memref<1x128xf32, #tpu.memory_space<vmem>>, %arg8: memref<8x128xf32, #tpu.memory_space<vmem>>) attributes {dimension_semantics = [#tpu.dimension_semantics<parallel>], iteration_bounds = array<i64: 1>, scalar_prefetch = 0 : i64, scratch_operands = 0 : i64, tpu.core_type = #tpu.core_type<tc>, window_params = [{transform_indices = @transform_0, window_bounds = array<i64: 8, 16>}, {pipeline_mode = #tpu.pipeline_mode<synchronous>, transform_indices = @transform_1, window_bounds = array<i64: 16, 128>}, {pipeline_mode = #tpu.pipeline_mode<synchronous>, transform_indices = @transform_2, window_bounds = array<i64: 1, 128>}, {pipeline_mode = #tpu.pipeline_mode<synchronous>, transform_indices = @transform_3, window_bounds = array<i64: 128, 128>}, {pipeline_mode = #tpu.pipeline_mode<synchronous>, transform_indices = @transform_4, window_bounds = array<i64: 1, 128>}, {pipeline_mode = #tpu.pipeline_mode<synchronous>, transform_indices = @transform_5, window_bounds = array<i64: 128, 128>}, {pipeline_mode = #tpu.pipeline_mode<synchronous>, transform_indices = @transform_6, window_bounds = array<i64: 1, 128>}, {transform_indices = @transform_7, window_bounds = array<i64: 8, 128>}]} {
    %c0 = arith.constant 0 : index
    %c0_0 = arith.constant 0 : index
    %0 = vector.load %arg1[%c0, %c0_0] : memref<8x16xf32, #tpu.memory_space<vmem>>, vector<8x16xf32>
    %c0_1 = arith.constant 0 : index
    %c0_2 = arith.constant 0 : index
    %1 = vector.load %arg2[%c0_1, %c0_2] : memref<16x128xf32, #tpu.memory_space<vmem>>, vector<16x128xf32>
    %cst = arith.constant dense<0.000000e+00> : vector<8x128xf32>
    %2 = tpu.matmul %0, %1, %cst {dimension_numbers = #tpu.dot_dimension_numbers<[1], [0], [0], [1], [0, 0, 1, 1], [], []>} : vector<8x16xf32>, vector<16x128xf32>, vector<8x128xf32> -> vector<8x128xf32>
    %c0_3 = arith.constant 0 : index
    %c0_4 = arith.constant 0 : index
    %3 = vector.load %arg3[%c0_3, %c0_4] : memref<1x128xf32, #tpu.memory_space<vmem>>, vector<1x128xf32>
    %4 = vector.broadcast %3 : vector<1x128xf32> to vector<8x128xf32>
    %5 = arith.addf %2, %4 : vector<8x128xf32>
    %cst_5 = arith.constant 0.000000e+00 : f32
    %6 = vector.broadcast %cst_5 : f32 to vector<8x128xf32>
    %7 = arith.maximumf %5, %6 : vector<8x128xf32>
    %c0_6 = arith.constant 0 : index
    %c0_7 = arith.constant 0 : index
    %8 = vector.load %arg4[%c0_6, %c0_7] : memref<128x128xf32, #tpu.memory_space<vmem>>, vector<128x128xf32>
    %cst_8 = arith.constant dense<0.000000e+00> : vector<8x128xf32>
    %9 = tpu.matmul %7, %8, %cst_8 {dimension_numbers = #tpu.dot_dimension_numbers<[1], [0], [0], [1], [0, 0, 1, 1], [], []>} : vector<8x128xf32>, vector<128x128xf32>, vector<8x128xf32> -> vector<8x128xf32>
    %c0_9 = arith.constant 0 : index
    %c0_10 = arith.constant 0 : index
    %10 = vector.load %arg5[%c0_9, %c0_10] : memref<1x128xf32, #tpu.memory_space<vmem>>, vector<1x128xf32>
    %11 = vector.broadcast %10 : vector<1x128xf32> to vector<8x128xf32>
    %12 = arith.addf %9, %11 : vector<8x128xf32>
    %cst_11 = arith.constant 0.000000e+00 : f32
    %13 = vector.broadcast %cst_11 : f32 to vector<8x128xf32>
    %14 = arith.maximumf %12, %13 : vector<8x128xf32>
    %c0_12 = arith.constant 0 : index
    %c0_13 = arith.constant 0 : index
    %15 = vector.load %arg6[%c0_12, %c0_13] : memref<128x128xf32, #tpu.memory_space<vmem>>, vector<128x128xf32>
    %cst_14 = arith.constant dense<0.000000e+00> : vector<8x128xf32>
    %16 = tpu.matmul %14, %15, %cst_14 {dimension_numbers = #tpu.dot_dimension_numbers<[1], [0], [0], [1], [0, 0, 1, 1], [], []>} : vector<8x128xf32>, vector<128x128xf32>, vector<8x128xf32> -> vector<8x128xf32>
    %c0_15 = arith.constant 0 : index
    %c0_16 = arith.constant 0 : index
    %17 = vector.load %arg7[%c0_15, %c0_16] : memref<1x128xf32, #tpu.memory_space<vmem>>, vector<1x128xf32>
    %18 = vector.broadcast %17 : vector<1x128xf32> to vector<8x128xf32>
    %19 = arith.addf %16, %18 : vector<8x128xf32>
    %c0_17 = arith.constant 0 : index
    %c0_18 = arith.constant 0 : index
    %20 = vector.load %arg8[%c0_17, %c0_18] : memref<8x128xf32, #tpu.memory_space<vmem>>, vector<8x128xf32>
    tpu.vector_store %arg8[%c0_17, %c0_18], %19 {strides = array<i32>} : memref<8x128xf32, #tpu.memory_space<vmem>>, vector<8x128xf32>,
    return
  }
  func.func @transform_0(%arg0: i32) -> (i32, i32) {
    %c0_i32 = arith.constant 0 : i32
    %c0_i32_0 = arith.constant 0 : i32
    return %arg0, %c0_i32 : i32, i32
  }
  func.func @transform_1(%arg0: i32) -> (i32, i32) {
    %c0_i32 = arith.constant 0 : i32
    %c0_i32_0 = arith.constant 0 : i32
    %c0_i32_1 = arith.constant 0 : i32
    return %c0_i32, %c0_i32_0 : i32, i32
  }
  func.func @transform_2(%arg0: i32) -> (i32, i32) {
    %c0_i32 = arith.constant 0 : i32
    %c0_i32_0 = arith.constant 0 : i32
    %c0_i32_1 = arith.constant 0 : i32
    return %c0_i32, %c0_i32_0 : i32, i32
  }
  func.func @transform_3(%arg0: i32) -> (i32, i32) {
    %c0_i32 = arith.constant 0 : i32
    %c0_i32_0 = arith.constant 0 : i32
    %c0_i32_1 = arith.constant 0 : i32
    return %c0_i32, %c0_i32_0 : i32, i32
  }
  func.func @transform_4(%arg0: i32) -> (i32, i32) {
    %c0_i32 = arith.constant 0 : i32
    %c0_i32_0 = arith.constant 0 : i32
    %c0_i32_1 = arith.constant 0 : i32
    return %c0_i32, %c0_i32_0 : i32, i32
  }
  func.func @transform_5(%arg0: i32) -> (i32, i32) {
    %c0_i32 = arith.constant 0 : i32
    %c0_i32_0 = arith.constant 0 : i32
    %c0_i32_1 = arith.constant 0 : i32
    return %c0_i32, %c0_i32_0 : i32, i32
  }
  func.func @transform_6(%arg0: i32) -> (i32, i32) {
    %c0_i32 = arith.constant 0 : i32
    %c0_i32_0 = arith.constant 0 : i32
    %c0_i32_1 = arith.constant 0 : i32
    return %c0_i32, %c0_i32_0 : i32, i32
  }
  func.func @transform_7(%arg0: i32) -> (i32, i32) {
    %c0_i32 = arith.constant 0 : i32
    %c0_i32_0 = arith.constant 0 : i32
    return %arg0, %c0_i32 : i32, i32
  }
}

</mosaic_0001>

<bundles_post_ra>
// kernel: qnet_forward.1
= control target key start
LH: loop header
LB: loop body
LE: loop exit
PB: predicated region body
PF: predicated region fallthrough
CT: control target
= control target key end

     0   :  { %12 = vsyncpa [#allocation3], 0  ;;  %s692_s0 = inlined_call_operand.hbm [shape: f32[8,16], index: 0, kind: input, shape index: {}]   ;;  %s693_s1 = inlined_call_operand.hbm [shape: f32[16,128], index: 1, kind: input, shape index: {}]   ;;  %s694_s2 = inlined_call_operand.vmem [shape: f32[1,128], index: 2, kind: input, shape index: {}]   ;;  %s695_s3 = inlined_call_operand.hbm [shape: f32[128,128], index: 3, kind: input, shape index: {}]   ;;  %s696_s4 = inlined_call_operand.vmem [shape: f32[1,128], index: 4, kind: input, shape index: {}]   ;;  %s697_s5 = inlined_call_operand.hbm [shape: f32[128,128], index: 5, kind: input, shape index: {}]   ;;  %s698_s6 = inlined_call_operand.vmem [shape: f32[1,128], index: 6, kind: input, shape index: {}]   ;;  %s699_s7 = inlined_call_operand.vmem [shape: f32[8,128], index: 7, kind: output, shape index: {}]  }
   0x1   :  { %13 = vsyncpa [#allocation5], 0 }
   0x2   :  { %14 = vsyncpa [#allocation8], 0  ;;  %s571_s24 = smov [#allocation4]  }
   0x3   :  { %s30_s25 = sshll.u32 %s571_s24, 4  ;;  %s31_s25 = int_to_ptr.vmem [resolvable:$true] %s30_s25 }
   0x4   :  { %s493_s26 = scalar_lea.vmem %s31_s25, 256  ;;  %p498_p1 = scmp.lt.s32.totalorder %s31_s25, %s31_s25 }
   0x5   :  { %p494_p0 = scmp.ne.s32.totalorder %s31_s25, %s493_s26  ;;  %p499_p2 = scmp.lt.s32.totalorder %s493_s26, %s493_s26 }
   0x7   :  { %p500_p3 = por %p499_p2, %p498_p1 }
   0x9   :  { %p501_p4 = pnand %p500_p3, %p494_p0 }
   0xb   :  { %504 = shalt.err (!%p501_p4)
}
   0xc   :  { %s572_s27 = smov 128   ;;  %s573_s28 = smov 8  }
   0xd   :  { %36 = dma.hbm_to_vmem [thread:$0]  %s693_s1, 256, %s31_s25, [#allocation5], %s572_s27, %s572_s27, %s573_s28  }
   0xe   :  { %s574_s8 = smov [#allocation2]   ;;  %s575_s10 = smov [#allocation6]  }
   0xf   :  { %s21_s9 = sshll.u32 %s574_s8, 4  ;;  %s44_s11 = sshll.u32 %s575_s10, 4  ;;  %s22_s9 = int_to_ptr.vmem [resolvable:$true] %s21_s9  ;;  %s45_s11 = int_to_ptr.vmem [resolvable:$true] %s44_s11 }
  0x10   :  { %s513_s12 = scalar_lea.vmem %s22_s9, 128  ;;  %p518_p6 = scmp.lt.s32.totalorder %s22_s9, %s22_s9 }
  0x11   :  { %p514_p5 = scmp.ne.s32.totalorder %s22_s9, %s513_s12  ;;  %p519_p7 = scmp.lt.s32.totalorder %s513_s12, %s513_s12 }
  0x13   :  { %p520_p8 = por %p519_p7, %p518_p6 }
  0x15   :  { %p521_p9 = pnand %p520_p8, %p514_p5 }
  0x17   :  { %524 = shalt.err (!%p521_p9)
}
  0x18   :  { %24 = dma.hbm_to_vmem [thread:$0]  %s692_s0, 128, %s22_s9, [#allocation3]  }
  0x19   :  { %s533_s15 = scalar_lea.vmem %s45_s11, 2048  ;;  %p538_p11 = scmp.lt.s32.totalorder %s45_s11, %s45_s11 }
  0x1a   :  { %p534_p10 = scmp.ne.s32.totalorder %s45_s11, %s533_s15  ;;  %p539_p12 = scmp.lt.s32.totalorder %s533_s15, %s533_s15 }
  0x1c   :  { %p540_p13 = por %p539_p12, %p538_p11 }
  0x1e   :  { %p541_p0 = pnand %p540_p13, %p534_p10 }
  0x20   :  { %544 = shalt.err (!%p541_p0)
}
  0x21   :  { %50 = dma.hbm_to_vmem [thread:$0]  %s695_s3, 2048, %s45_s11, [#allocation5], %s572_s27, %s572_s27, %s573_s28  }
  0x22   :  { %s576_s17 = smov [#allocation7]  }
  0x23   :  { %s58_s18 = sshll.u32 %s576_s17, 4  ;;  %s59_s18 = int_to_ptr.vmem [resolvable:$true] %s58_s18 }
  0x24   :  { %s553_s19 = scalar_lea.vmem %s59_s18, 2048  ;;  %p558_p2 = scmp.lt.s32.totalorder %s59_s18, %s59_s18 }
  0x25   :  { %p554_p1 = scmp.ne.s32.totalorder %s59_s18, %s553_s19  ;;  %p559_p3 = scmp.lt.s32.totalorder %s553_s19, %s553_s19 }
  0x27   :  { %p560_p4 = por %p559_p3, %p558_p2 }
  0x29   :  { %p561_p5 = pnand %p560_p4, %p554_p1 }
  0x2b   :  { %564 = shalt.err (!%p561_p5)
}
  0x2c   :  { %64 = dma.hbm_to_vmem [thread:$0]  %s697_s5, 2048, %s59_s18, [#allocation8], %s572_s27, %s572_s27, %s573_s28  }
  0x2d   :  { %565 = dma.done.wait [#allocation3], 128  }
  0x2e   :  { %566 = vsyncadd [#allocation3], 4294967168 }
  0x2f   :  { %567 = dma.done.wait [#allocation5], 2304  }
  0x30   :  { %568 = vsyncadd [#allocation5], 4294964992 }
  0x31   :  { %569 = dma.done.wait [#allocation8], 2048  }
  0x32   :  { %570 = vsyncadd [#allocation8], 4294965248  ;;  %v577_v0 = vmov 0.0   ;;  %vm578_vm0 = vmmov 0   ;;  %v81_v1 = vld [vmem:[#allocation4 + $0x8] sm:$0xff]  ;;  %v80_v2 = vld [vmem:[#allocation4] sm:$0xff] }
  0x33   :  { %400 = vmatprep.subr.mxu0 %v577_v0  ;;  %404 = vmatprep.mubr.msk.f32.mxu0 %vm578_vm0, %v577_v0  ;;  %v79_v3 = vld [vmem:[#allocation2] sm:$0xff]  ;;  %vm89_vm1 = vcmask 130048   ;;  %v179_v4 = vld [vmem:[#allocation6 + $0x78] sm:$0xff]  ;;  %v178_v5 = vld [vmem:[#allocation6 + $0x70] sm:$0xff] }
  0x34   :  { %407 = vmatprep.subr.mxu1 %v577_v0  ;;  %439 = vmatprep.mubr.msk.f32.mxu1 %vm578_vm0, %v577_v0  ;;  %v177_v6 = vld [vmem:[#allocation6 + $0x68] sm:$0xff]  ;;  %v176_v7 = vld [vmem:[#allocation6 + $0x60] sm:$0xff]  ;;  %v175_v8 = vld [vmem:[#allocation6 + $0x58] sm:$0xff] }
  0x35   :  { %401 = vmatpush3.msra.mxu0 %v81_v1  ;;  %408 = vmatpush3.msra.mxu1 %v179_v4  ;;  %v174_v9 = vld [vmem:[#allocation6 + $0x50] sm:$0xff]  ;;  %v173_v10 = vld [vmem:[#allocation6 + $0x48] sm:$0xff]  ;;  %v172_v11 = vld [vmem:[#allocation6 + $0x40] sm:$0xff] }
  0x36   :  { %402 = vmatprep.subr.mxu0 %v577_v0  ;;  %409 = vmatprep.subr.mxu1 %v577_v0  ;;  %v171_v12 = vld [vmem:[#allocation6 + $0x38] sm:$0xff]  ;;  %v170_v13 = vld [vmem:[#allocation6 + $0x30] sm:$0xff]  ;;  %v169_v14 = vld [vmem:[#allocation6 + $0x28] sm:$0xff] }
  0x37   :  { %403 = vmatpush3.msra.mxu0 %v80_v2  ;;  %410 = vmatpush3.msra.mxu1 %v178_v5  ;;  %v168_v15 = vld [vmem:[#allocation6 + $0x20] sm:$0xff]  ;;  %v167_v16 = vld [vmem:[#allocation6 + $0x18] sm:$0xff]  ;;  %v166_v17 = vld [vmem:[#allocation6 + $0x10] sm:$0xff] }
  0x38   :  { %405 = vmatmul.mubr.msk.f32.vlgmr.msra.gmra.mxu0 %vm89_vm1, %v79_v3  ;;  %411 = vmatprep.subr.mxu1 %v577_v0  ;;  %v165_v18 = vld [vmem:[#allocation6 + $0x8] sm:$0xff]  ;;  %v164_v19 = vld [vmem:[#allocation6] sm:$0xff]  ;;  %v273_v20 = vld [vmem:[#allocation7 + $0x78] sm:$0xff] }
  0x39   :  { %442 = vmatprep.subr.mxu0 %v577_v0  ;;  %412 = vmatpush3.msra.mxu1 %v177_v6  ;;  %v272_v21 = vld [vmem:[#allocation7 + $0x70] sm:$0xff]  ;;  %v271_v22 = vld [vmem:[#allocation7 + $0x68] sm:$0xff]  ;;  %v270_v23 = vld [vmem:[#allocation7 + $0x60] sm:$0xff] }
  0x3a   :  { %474 = vmatprep.mubr.msk.f32.mxu0 %vm578_vm0, %v577_v0  ;;  %413 = vmatprep.subr.mxu1 %v577_v0  ;;  %v269_v24 = vld [vmem:[#allocation7 + $0x58] sm:$0xff]  ;;  %v268_v25 = vld [vmem:[#allocation7 + $0x50] sm:$0xff]  ;;  %v267_v26 = vld [vmem:[#allocation7 + $0x48] sm:$0xff] }
  0x3b   :  { %414 = vmatpush3.msra.mxu1 %v176_v7  ;;  %443 = vmatpush3.msra.mxu0 %v273_v20  ;;  %v266_v27 = vld [vmem:[#allocation7 + $0x40] sm:$0xff]  ;;  %v265_v28 = vld [vmem:[#allocation7 + $0x38] sm:$0xff]  ;;  %v264_v29 = vld [vmem:[#allocation7 + $0x30] sm:$0xff] }
  0x3c   :  { %415 = vmatprep.subr.mxu1 %v577_v0  ;;  %444 = vmatprep.subr.mxu0 %v577_v0  ;;  %v263_v30 = vld [vmem:[#allocation7 + $0x28] sm:$0xff]  ;;  %v262_v31 = vld [vmem:[#allocation7 + $0x20] sm:$0xff]  ;;  %v261_v32 = vld [vmem:[#allocation7 + $0x18] sm:$0xff] }
  0x3d   :  { %416 = vmatpush3.msra.mxu1 %v175_v8  ;;  %445 = vmatpush3.msra.mxu0 %v272_v21  ;;  %v359_v33 = vld [vmem:[%s694_s2] ss:$0 sm:$0xff]  ;;  %v260_v38 = vld [vmem:[#allocation7 + $0x10] sm:$0xff]  ;;  %v258_v40 = vld [vmem:[#allocation7] sm:$0xff] }
  0x3e   :  { %417 = vmatprep.subr.mxu1 %v577_v0  ;;  %446 = vmatprep.subr.mxu0 %v577_v0  ;;  %v259_v39 = vld [vmem:[#allocation7 + $0x8] sm:$0xff] }
  0x3f   :  { %418 = vmatpush3.msra.mxu1 %v174_v9  ;;  %447 = vmatpush3.msra.mxu0 %v271_v22  ;;  %v361_v41 = vld [vmem:[%s696_s4] ss:$0 sm:$0xff] }
  0x40   :  { %419 = vmatprep.subr.mxu1 %v577_v0  ;;  %448 = vmatprep.subr.mxu0 %v577_v0  ;;  %v362_v46 = vld [vmem:[%s698_s6] ss:$0 sm:$0xff] }
  0x41   :  { %420 = vmatpush3.msra.mxu1 %v173_v10  ;;  %449 = vmatpush3.msra.mxu0 %v270_v23 }
  0x42   :  { %421 = vmatprep.subr.mxu1 %v577_v0  ;;  %450 = vmatprep.subr.mxu0 %v577_v0 }
  0x43   :  { %422 = vmatpush3.msra.mxu1 %v172_v11  ;;  %451 = vmatpush3.msra.mxu0 %v269_v24 }
  0x44   :  { %423 = vmatprep.subr.mxu1 %v577_v0  ;;  %452 = vmatprep.subr.mxu0 %v577_v0 }
  0x45   :  { %424 = vmatpush3.msra.mxu1 %v171_v12  ;;  %453 = vmatpush3.msra.mxu0 %v268_v25 }
  0x46   :  { %425 = vmatprep.subr.mxu1 %v577_v0  ;;  %454 = vmatprep.subr.mxu0 %v577_v0 }
  0x47   :  { %426 = vmatpush3.msra.mxu1 %v170_v13  ;;  %455 = vmatpush3.msra.mxu0 %v267_v26 }
  0x48   :  { %427 = vmatprep.subr.mxu1 %v577_v0  ;;  %456 = vmatprep.subr.mxu0 %v577_v0 }
  0x49   :  { %428 = vmatpush3.msra.mxu1 %v169_v14  ;;  %457 = vmatpush3.msra.mxu0 %v266_v27 }
  0x4a   :  { %429 = vmatprep.subr.mxu1 %v577_v0  ;;  %458 = vmatprep.subr.mxu0 %v577_v0 }
  0x4b   :  { %430 = vmatpush3.msra.mxu1 %v168_v15  ;;  %459 = vmatpush3.msra.mxu0 %v265_v28 }
  0x4c   :  { %431 = vmatprep.subr.mxu1 %v577_v0  ;;  %460 = vmatprep.subr.mxu0 %v577_v0 }
  0x4d   :  { %432 = vmatpush3.msra.mxu1 %v167_v16  ;;  %461 = vmatpush3.msra.mxu0 %v264_v29 }
  0x4e   :  { %433 = vmatprep.subr.mxu1 %v577_v0  ;;  %462 = vmatprep.subr.mxu0 %v577_v0 }
  0x4f   :  { %434 = vmatpush3.msra.mxu1 %v166_v17  ;;  %463 = vmatpush3.msra.mxu0 %v263_v30 }
  0x50   :  { %435 = vmatprep.subr.mxu1 %v577_v0  ;;  %464 = vmatprep.subr.mxu0 %v577_v0 }
  0x51   :  { %436 = vmatpush3.msra.mxu1 %v165_v18  ;;  %465 = vmatpush3.msra.mxu0 %v262_v31 }
  0x52   :  { %437 = vmatprep.subr.mxu1 %v577_v0  ;;  %466 = vmatprep.subr.mxu0 %v577_v0 }
  0x53   :  { %438 = vmatpush3.msra.mxu1 %v164_v19  ;;  %467 = vmatpush3.msra.mxu0 %v261_v32 }
  0x54   :  { %468 = vmatprep.subr.mxu0 %v577_v0 }
  0x55   :  { %469 = vmatpush3.msra.mxu0 %v260_v38 }
  0x56   :  { %470 = vmatprep.subr.mxu0 %v577_v0 }
  0x57   :  { %471 = vmatpush3.msra.mxu0 %v259_v39 }
  0x58   :  { %472 = vmatprep.subr.mxu0 %v577_v0 }
  0x59   :  { %473 = vmatpush3.msra.mxu0 %v258_v40 }
  0xf8   :  { %v159_v34 = vpop.f32.mrf.mxu0 }
  0xf9   :  { %v160_v35 = vadd.f32 %v359_v33, %v159_v34 }
  0xfa   :  { %v406_v36 = vpop.f32.mrf.mxu0 }
  0xfb   :  { %v163_v37 = vmax.f32 %v160_v35, 0.0 }
  0xfd   :  { %440 = vmatmul.mubr.f32.vlgmr.msra.gmra.mxu1 %v163_v37 }
 0x1bd   :  { %v253_v42 = vpop.f32.mrf.mxu1 }
 0x1be   :  { %v254_v43 = vadd.f32 %v361_v41, %v253_v42 }
 0x1bf   :  { %v441_v44 = vpop.f32.mrf.mxu1 }
 0x1c0   :  { %v257_v45 = vmax.f32 %v254_v43, 0.0 }
 0x1c2   :  { %475 = vmatmul.mubr.f32.vlgmr.msra.gmra.mxu0 %v257_v45 }
 0x282   :  { %v347_v47 = vpop.f32.mrf.mxu0 }
 0x283   :  { %v348_v48 = vadd.f32 %v362_v46, %v347_v47 }
 0x284   :  { %v476_v49 = vpop.f32.mrf.mxu0 }
 0x285   :  { %351 = vst [vmem:[%s699_s7] sm:$0xff] %v348_v48 }
 0x286   :  { %356 = vsyncpa [#allocation3], 1 }
 0x287   :  { %357 = vsyncpa [#allocation5], 1 }
 0x288   :  { %358 = vsyncpa [#allocation8], 1 }

</bundles_post_ra>
